<compile_context>
chip_gen: v7x
topology: tpu7x:2x2x1
jax: 0.10.0
libtpu: 0.0.40
codegen_flags: <defaults>
</compile_context>

<pallas_src>
import functools

import jax
import jax.numpy as jnp
from jax.experimental import pallas as pl
from jax.experimental.pallas import tpu as pltpu


# ------------------------------ helpers --------------------------------------
def _round_up(n, m):
    return ((n + m - 1) // m) * m


def _pad_to(a, shape):
    pads = [(0, t - s) for s, t in zip(a.shape, shape)]
    return jnp.pad(a, pads)


def _pick_tile(n_pad, cap):
    """Largest multiple of 128 that divides n_pad and is <= cap (>=128)."""
    t = max(128, min((cap // 128) * 128, n_pad))
    while n_pad % t != 0:
        t -= 128
    return t


# --------------------------- Pallas kernel -----------------------------------
def _aggregate_kernel(a_ref, xw_ref, b_ref, out_ref, *, num_classes, tk,
                      xw_resident):
    """Tiled out = log_softmax(A_hat @ XW + b) over grid (row tile i, K tile k).

    out_ref (f32, constant block index over k) doubles as the accumulator.
    """
    k = pl.program_id(1)

    @pl.when(k == 0)
    def _():
        out_ref[...] = jnp.zeros_like(out_ref)

    if xw_resident:
        # XW lives fully in VMEM; slice the current K window.
        start = pl.multiple_of(k * tk, 128)
        xw_tile = xw_ref[pl.ds(start, tk), :]
    else:
        # XW streamed one (TK, Cp) block per K step via its BlockSpec.
        xw_tile = xw_ref[...]

    # [TM, TK] bf16 @ [TK, Cp] bf16 -> f32 accumulate on the MXU.
    out_ref[...] += jnp.dot(
        a_ref[...], xw_tile, preferred_element_type=jnp.float32
    )

    @pl.when(k == pl.num_programs(1) - 1)
    def _():
        h = out_ref[...] + b_ref[...]                        # f32 [TM, Cp]
        # Mask padded class columns so they don't affect max / sum.
        col = jax.lax.broadcasted_iota(jnp.int32, h.shape, 1)
        h = jnp.where(col < num_classes, h, -jnp.inf)
        m = jnp.max(h, axis=1, keepdims=True)
        s = h - m
        lse = jnp.log(jnp.sum(jnp.exp(s), axis=1, keepdims=True))
        out_ref[...] = s - lse                               # lane-dense f32 store


# ------------------------------- wrapper --------------------------------------
def gcn_cls_forward(x, edge_index, w, b):
    """log_softmax(A_hat @ (x @ W) + b, axis=1); aggregation runs in Pallas."""
    n, _ = x.shape
    c = w.shape[1]
    cp = _round_up(max(c, 128), 128)          # lane-dense class dim
    n_pad = _round_up(n, 128)                 # pad N only to 128, not to tile

    # Tile selection: TM modest (and >=2 row tiles when possible, for v7x's
    # two TensorCores); TK large to amortize per-step overhead / XW re-reads.
    tm = _pick_tile(n_pad, min(512, n_pad // 2 if n_pad >= 256 else n_pad))
    tk = _pick_tile(n_pad, 2048)
    grid = (n_pad // tm, n_pad // tk)

    # A_hat built directly padded and in bf16 (single scatter pass, no pad+cast).
    a_p = build_normalized_adjacency(edge_index, n, n_pad, dtype=jnp.bfloat16)

    # Feature transform XW = x @ W is O(N*F*C) -- negligible; let XLA do it.
    xw = jnp.dot(x, w)                                         # [N, C] f32
    xw_p = _pad_to(xw, (n_pad, cp)).astype(jnp.bfloat16)       # [n_pad, Cp] bf16
    b_p = _pad_to(b.reshape(1, -1), (1, cp)).astype(jnp.float32)

    # Keep XW fully VMEM-resident when small (fetched once), else stream tiles.
    xw_resident = (n_pad * cp * 2) <= (8 * 1024 * 1024)
    if xw_resident:
        xw_spec = pl.BlockSpec((n_pad, cp), lambda i, k: (0, 0))
    else:
        xw_spec = pl.BlockSpec((tk, cp), lambda i, k: (k, 0))

    out_p = pl.pallas_call(
        functools.partial(
            _aggregate_kernel, num_classes=c, tk=tk, xw_resident=xw_resident
        ),
        out_shape=jax.ShapeDtypeStruct((n_pad, cp), jnp.float32),
        grid=grid,                               # (dst-row tiles, src/K tiles)
        in_specs=[
            pl.BlockSpec((tm, tk), lambda i, k: (i, k)),   # A_hat tile
            xw_spec,                                       # XW (resident/streamed)
            pl.BlockSpec((1, cp), lambda i, k: (0, 0)),    # bias
        ],
        out_specs=pl.BlockSpec((tm, cp), lambda i, k: (i, 0)),  # acc + result
        compiler_params=pltpu.CompilerParams(
            dimension_semantics=("parallel", "arbitrary"),
            vmem_limit_bytes=32 * 1024 * 1024,
        ),
    )(a_p, xw_p, b_p)

    return out_p[:n, :c]


# ------------------------- glue: graph preprocessing --------------------------
def build_normalized_adjacency(edge_index, num_nodes, num_nodes_padded=None,
                               dtype=jnp.bfloat16):
    """Dense A_hat = D^{-1/2}(A + I)D^{-1/2}, A_hat[dst, src] per PyG GCNConv.

    Built directly at the padded size and target dtype (single scatter pass).
    Padded rows/columns stay zero, so they contribute nothing to the matmul.
    """
    if num_nodes_padded is None:
        num_nodes_padded = num_nodes
    src, dst = edge_index[0], edge_index[1]
    loops = jnp.arange(num_nodes, dtype=src.dtype)
    src = jnp.concatenate([src, loops])
    dst = jnp.concatenate([dst, loops])
    ew = jnp.ones(src.shape[0], dtype=jnp.float32)
    deg = jnp.zeros((num_nodes,), jnp.float32).at[dst].add(ew)
    deg_inv_sqrt = jnp.where(deg > 0, jax.lax.rsqrt(deg), 0.0)
    norm = (deg_inv_sqrt[src] * deg_inv_sqrt[dst]).astype(dtype)
    a_hat = jnp.zeros((num_nodes_padded, num_nodes_padded), dtype)
    a_hat = a_hat.at[dst, src].add(norm)
    return a_hat


def glorot(key, shape):
    fan_in, fan_out = shape
    limit = jnp.sqrt(6.0 / (fan_in + fan_out))
    return jax.random.uniform(key, shape, jnp.float32, -limit, limit)


# ---------------------------------- main ---------------------------------------
if __name__ == "__main__":
    # Small synthetic "Cora-like" problem: CLS(d_in=32, d_out=8).
    N = 64        # nodes
    F_IN = 32     # d_in (num features)
    C = 8         # d_out (num classes)
    E = 256       # directed edges

    key = jax.random.PRNGKey(0)
    kx, ke1, ke2, kw = jax.random.split(key, 4)

    x = jax.random.normal(kx, (N, F_IN), jnp.float32)
    edge_src = jax.random.randint(ke1, (E,), 0, N, jnp.int32)
    edge_dst = jax.random.randint(ke2, (E,), 0, N, jnp.int32)
    edge_index = jnp.stack([edge_src, edge_dst])          # [2, E]

    # PyG GCNConv default init: glorot weight, zero bias.
    w = glorot(kw, (F_IN, C))
    b = jnp.zeros((C,), jnp.float32)

    out = gcn_cls_forward(x, edge_index, w, b)
    out = jax.block_until_ready(out)

    # Sanity 1: log_softmax rows sum (in prob space) to 1.
    assert out.shape == (N, C)
    assert jnp.allclose(jnp.sum(jnp.exp(out), axis=1), 1.0, atol=1e-4)

    # Sanity 2: matches a pure-JAX f32 reference within bf16 tolerance.
    a_ref = build_normalized_adjacency(edge_index, N, N, dtype=jnp.float32)
    ref = jax.nn.log_softmax(a_ref @ (x @ w) + b, axis=1)
    assert jnp.allclose(out, ref, atol=5e-2, rtol=5e-2)

    print("KERNEL_OK")
</pallas_src>

<mosaic_0001>
module attributes {stable_mosaic.version = 11 : i64} {
  func.func @_aggregate_kernel(%arg0: i32, %arg1: i32, %arg2: memref<128x128xbf16, #tpu.memory_space<vmem>>, %arg3: memref<128x128xbf16, #tpu.memory_space<vmem>>, %arg4: memref<1x128xf32, #tpu.memory_space<vmem>>, %arg5: memref<128x128xf32, #tpu.memory_space<vmem>>) attributes {dimension_semantics = [#tpu.dimension_semantics<parallel>, #tpu.dimension_semantics<arbitrary>], iteration_bounds = array<i64: 1, 1>, scalar_prefetch = 0 : i64, scratch_operands = 0 : i64, tpu.core_type = #tpu.core_type<tc>, window_params = [{transform_indices = @transform_0, window_bounds = array<i64: 128, 128>}, {pipeline_mode = #tpu.pipeline_mode<synchronous>, transform_indices = @transform_1, window_bounds = array<i64: 128, 128>}, {pipeline_mode = #tpu.pipeline_mode<synchronous>, transform_indices = @transform_2, window_bounds = array<i64: 1, 128>}, {transform_indices = @transform_3, window_bounds = array<i64: 128, 128>}]} {
    %c0_i32 = arith.constant 0 : i32
    %0 = arith.cmpi eq, %arg1, %c0_i32 : i32
    %1 = arith.extui %0 : i1 to i32
    %c0_i32_0 = arith.constant 0 : i32
    %2 = arith.cmpi ne, %1, %c0_i32_0 : i32
    scf.if %2 {
      %cst_9 = arith.constant 0.000000e+00 : f32
      %15 = vector.broadcast %cst_9 : f32 to vector<128x128xf32>
      %c0_10 = arith.constant 0 : index
      %c0_11 = arith.constant 0 : index
      %16 = vector.load %arg5[%c0_10, %c0_11] : memref<128x128xf32, #tpu.memory_space<vmem>>, vector<128x128xf32>
      tpu.vector_store %arg5[%c0_10, %c0_11], %15 {strides = array<i32>} : memref<128x128xf32, #tpu.memory_space<vmem>>, vector<128x128xf32>,
    } else {
    }
    %c128_i32 = arith.constant 128 : i32
    %3 = arith.muli %arg1, %c128_i32 : i32
    %4 = tpu.assume_multiple %3, 128 : i32
    %5 = arith.index_cast %4 : i32 to index
    %c0 = arith.constant 0 : index
    %6 = vector.load %arg3[%5, %c0] : memref<128x128xbf16, #tpu.memory_space<vmem>>, vector<128x128xbf16>
    %c0_1 = arith.constant 0 : index
    %c0_2 = arith.constant 0 : index
    %7 = vector.load %arg5[%c0_1, %c0_2] : memref<128x128xf32, #tpu.memory_space<vmem>>, vector<128x128xf32>
    %c0_3 = arith.constant 0 : index
    %c0_4 = arith.constant 0 : index
    %8 = vector.load %arg2[%c0_3, %c0_4] : memref<128x128xbf16, #tpu.memory_space<vmem>>, vector<128x128xbf16>
    %cst = arith.constant dense<0.000000e+00> : vector<128x128xf32>
    %9 = tpu.matmul %8, %6, %cst {dimension_numbers = #tpu.dot_dimension_numbers<[1], [0], [0], [1], [0, 0, 1, 1], [], []>} : vector<128x128xbf16>, vector<128x128xbf16>, vector<128x128xf32> -> vector<128x128xf32>
    %10 = arith.addf %7, %9 : vector<128x128xf32>
    %c0_5 = arith.constant 0 : index
    %c0_6 = arith.constant 0 : index
    %11 = vector.load %arg5[%c0_5, %c0_6] : memref<128x128xf32, #tpu.memory_space<vmem>>, vector<128x128xf32>
    tpu.vector_store %arg5[%c0_5, %c0_6], %10 {strides = array<i32>} : memref<128x128xf32, #tpu.memory_space<vmem>>, vector<128x128xf32>,
    %c0_i32_7 = arith.constant 0 : i32
    %12 = arith.cmpi eq, %arg1, %c0_i32_7 : i32
    %13 = arith.extui %12 : i1 to i32
    %c0_i32_8 = arith.constant 0 : i32
    %14 = arith.cmpi ne, %13, %c0_i32_8 : i32
    scf.if %14 {
      %c0_9 = arith.constant 0 : index
      %c0_10 = arith.constant 0 : index
      %15 = vector.load %arg5[%c0_9, %c0_10] : memref<128x128xf32, #tpu.memory_space<vmem>>, vector<128x128xf32>
      %c0_11 = arith.constant 0 : index
      %c0_12 = arith.constant 0 : index
      %16 = vector.load %arg4[%c0_11, %c0_12] : memref<1x128xf32, #tpu.memory_space<vmem>>, vector<1x128xf32>
      %17 = vector.broadcast %16 : vector<1x128xf32> to vector<128x128xf32>
      %18 = arith.addf %15, %17 : vector<128x128xf32>
      %19 = tpu.iota {dimensions = array<i32: 1>} : vector<128x128xi32>
      %c8_i32 = arith.constant 8 : i32
      %20 = vector.broadcast %c8_i32 : i32 to vector<128x128xi32>
      %21 = arith.cmpi slt, %19, %20 : vector<128x128xi32>
      %cst_13 = arith.constant 0xFF800000 : f32
      %22 = vector.broadcast %cst_13 : f32 to vector<128x128xf32>
      %23 = arith.select %21, %18, %22 : vector<128x128xi1>, vector<128x128xf32>
      %cst_14 = arith.constant dense<0xFF800000> : vector<128xf32>
      %24 = vector.multi_reduction <maximumf>, %23, %cst_14 [1] : vector<128x128xf32> to vector<128xf32>
      %25 = vector.shape_cast %24 : vector<128xf32> to vector<128x1xf32>
      %26 = vector.broadcast %25 : vector<128x1xf32> to vector<128x128xf32>
      %27 = arith.subf %23, %26 : vector<128x128xf32>
      %28 = math.exp %27 : vector<128x128xf32>
      %cst_15 = arith.constant dense<0.000000e+00> : vector<128xf32>
      %29 = vector.multi_reduction <add>, %28, %cst_15 [1] : vector<128x128xf32> to vector<128xf32>
      %30 = vector.shape_cast %29 : vector<128xf32> to vector<128x1xf32>
      %31 = math.log %30 : vector<128x1xf32>
      %32 = vector.broadcast %31 : vector<128x1xf32> to vector<128x128xf32>
      %33 = arith.subf %27, %32 : vector<128x128xf32>
      %c0_16 = arith.constant 0 : index
      %c0_17 = arith.constant 0 : index
      %34 = vector.load %arg5[%c0_16, %c0_17] : memref<128x128xf32, #tpu.memory_space<vmem>>, vector<128x128xf32>
      tpu.vector_store %arg5[%c0_16, %c0_17], %33 {strides = array<i32>} : memref<128x128xf32, #tpu.memory_space<vmem>>, vector<128x128xf32>,
    } else {
    }
    return
  }
  func.func @transform_0(%arg0: i32, %arg1: i32) -> (i32, i32) {
    %c0_i32 = arith.constant 0 : i32
    return %arg0, %arg1 : i32, i32
  }
  func.func @transform_1(%arg0: i32, %arg1: i32) -> (i32, i32) {
    %c0_i32 = arith.constant 0 : i32
    %c0_i32_0 = arith.constant 0 : i32
    %c0_i32_1 = arith.constant 0 : i32
    return %c0_i32, %c0_i32_0 : i32, i32
  }
  func.func @transform_2(%arg0: i32, %arg1: i32) -> (i32, i32) {
    %c0_i32 = arith.constant 0 : i32
    %c0_i32_0 = arith.constant 0 : i32
    %c0_i32_1 = arith.constant 0 : i32
    return %c0_i32, %c0_i32_0 : i32, i32
  }
  func.func @transform_3(%arg0: i32, %arg1: i32) -> (i32, i32) {
    %c0_i32 = arith.constant 0 : i32
    %c0_i32_0 = arith.constant 0 : i32
    return %arg0, %c0_i32 : i32, i32
  }
}

</mosaic_0001>

<bundles_post_ra>
// kernel: tpu_custom_call.1
= control target key start
LH: loop header
LB: loop body
LE: loop exit
PB: predicated region body
PF: predicated region fallthrough
CT: control target
= control target key end

     0   :  { %8 = vsyncpa [#allocation3], 0  ;;  %s1021_s0 = inlined_call_operand.hbm [shape: bf16[128,128], index: 0, kind: input, shape index: {}]   ;;  %s1022_s1 = inlined_call_operand.hbm [shape: bf16[128,128], index: 1, kind: input, shape index: {}]   ;;  %s1023_s2 = inlined_call_operand.vmem [shape: f32[1,128], index: 2, kind: input, shape index: {}]   ;;  %s1024_s3 = inlined_call_operand.hbm [shape: f32[128,128], index: 3, kind: output, shape index: {}]  }
   0x1   :  { %9 = vsyncpa [#allocation6], 0 }
   0x2   :  { %10 = vsyncpa [#allocation4], 0  ;;  %s840_s12 = smov [#allocation2]   ;;  %s768_s16 = scalar_lea.hbm %s1021_s0, 1024 }
   0x3   :  { %s16_s13 = sshll.u32 %s840_s12, 4  ;;  %p769_p0 = scmp.ne.s32.totalorder %s1021_s0, %s768_s16  ;;  %s17_s13 = int_to_ptr.vmem [resolvable:$true] %s16_s13 }
   0x4   :  { %p772_p1 = scmp.lt.u32.totalorder %s768_s16, %s1021_s0 }
   0x6   :  { %p774_p2 = pnand %p772_p1, %p769_p0 }
   0x8   :  { %777 = shalt.err (!%p774_p2)
}
   0x9   :  { %s778_s21 = scalar_lea.vmem %s17_s13, 1024  ;;  %p783_p4 = scmp.lt.s32.totalorder %s17_s13, %s17_s13 }
   0xa   :  { %p779_p3 = scmp.ne.s32.totalorder %s17_s13, %s778_s21  ;;  %p784_p5 = scmp.lt.s32.totalorder %s778_s21, %s778_s21 }
   0xc   :  { %p785_p6 = por %p784_p5, %p783_p4 }
   0xe   :  { %p786_p7 = pnand %p785_p6, %p779_p3 }
  0x10   :  { %789 = shalt.err (!%p786_p7)
}
  0x11   :  { %s841_s22 = smov 64   ;;  %s842_s23 = smov 4  }
  0x12   :  { %22 = dma.hbm_to_vmem [thread:$0]  %s1021_s0, 1024, %s17_s13, [#allocation3], %s841_s22, %s841_s22, %s842_s23  }
  0x13   :  { %s843_s26 = smov [#allocation5]   ;;  %s790_s30 = scalar_lea.hbm %s1022_s1, 1024 }
  0x14   :  { %s28_s27 = sshll.u32 %s843_s26, 4  ;;  %p791_p8 = scmp.ne.s32.totalorder %s1022_s1, %s790_s30  ;;  %s29_s27 = int_to_ptr.vmem [resolvable:$true] %s28_s27 }
  0x15   :  { %p794_p9 = scmp.lt.u32.totalorder %s790_s30, %s1022_s1 }
  0x17   :  { %p796_p10 = pnand %p794_p9, %p791_p8 }
  0x19   :  { %799 = shalt.err (!%p796_p10)
}
  0x1a   :  { %s800_s8 = scalar_lea.vmem %s29_s27, 1024  ;;  %p805_p12 = scmp.lt.s32.totalorder %s29_s27, %s29_s27 }
  0x1b   :  { %p801_p11 = scmp.ne.s32.totalorder %s29_s27, %s800_s8  ;;  %p806_p13 = scmp.lt.s32.totalorder %s800_s8, %s800_s8 }
  0x1d   :  { %p807_p0 = por %p806_p13, %p805_p12 }
  0x1f   :  { %p808_p1 = pnand %p807_p0, %p801_p11 }
  0x21   :  { %811 = shalt.err (!%p808_p1)
}
  0x22   :  { %34 = dma.hbm_to_vmem [thread:$0]  %s1022_s1, 1024, %s29_s27, [#allocation6], %s841_s22, %s841_s22, %s842_s23  }
  0x23   :  { %834 = dma.done.wait [#allocation3], 1024  }
  0x24   :  { %835 = vsyncadd [#allocation3], 4294966272 }
  0x25   :  { %836 = dma.done.wait [#allocation6], 1024  }
  0x26   :  { %837 = vsyncadd [#allocation6], 4294966272  ;;  %v688_v0 = vld [vmem:[#allocation5] sm:$0xff]   ;;  %v689_v1 = vld [vmem:[#allocation5 + $0x8] sm:$0xff]   ;;  %v384_v16 = vlaneseq }
  0x27   :  { %632 = vmatprep.subr.bf16.mxu0 %v688_v0  ;;  %664 = vmatprep.subr.bf16.mxu1 %v688_v0  ;;  %v690_v2 = vld [vmem:[#allocation5 + $0x10] sm:$0xff]   ;;  %v691_v3 = vld [vmem:[#allocation5 + $0x18] sm:$0xff]   ;;  %v696_v4 = vld [vmem:[#allocation2] sm:$0xff]  }
  0x28   :  { %633 = vmatpush3.bf16.msra.mxu0 %v688_v0  ;;  %672 = vmatpush3.bf16.msra.mxu1 %v688_v0  ;;  %v697_v5 = vld [vmem:[#allocation2 + $0x20] sm:$0xff]   ;;  %v693_v7 = vld [vmem:[#allocation5 + $0x28] sm:$0xff]   ;;  %v694_v8 = vld [vmem:[#allocation5 + $0x30] sm:$0xff]   ;;  %v891_v17 = vand.u32 127, %v384_v16 }
  0x29   :  { %634 = vmatprep.subr.bf16.mxu0 %v689_v1  ;;  %665 = vmatprep.subr.bf16.mxu1 %v689_v1  ;;  %v692_v6 = vld [vmem:[#allocation5 + $0x20] sm:$0xff]   ;;  %v695_v9 = vld [vmem:[#allocation5 + $0x38] sm:$0xff]   ;;  %v698_v10 = vld [vmem:[#allocation2 + $0x8] sm:$0xff]  }
  0x2a   :  { %648 = vmatprep.mubr.bf16.mxu0 %v696_v4  ;;  %656 = vmatprep.mubr.bf16.mxu1 %v697_v5  ;;  %v699_v11 = vld [vmem:[#allocation2 + $0x28] sm:$0xff]   ;;  %v700_v12 = vld [vmem:[#allocation2 + $0x10] sm:$0xff]   ;;  %v701_v14 = vld [vmem:[#allocation2 + $0x18] sm:$0xff]   ;;  %vm386_vm0 = vcmp.lt.s32.totalorder %v891_v17, 8 }
  0x2b   :  { %v702_v13 = vld [vmem:[#allocation2 + $0x30] sm:$0xff]   ;;  %v703_v15 = vld [vmem:[#allocation2 + $0x38] sm:$0xff]   ;;  %v615_v20 = vld [vmem:[%s1023_s2] ss:$0 sm:$0xff]  ;;  %s844_s2 = smov [#allocation7]  }
  0x2c   :  { %635 = vmatpush3.bf16.msra.mxu0 %v689_v1  ;;  %673 = vmatpush3.bf16.msra.mxu1 %v689_v1  ;;  %s584_s11 = sshll.u32 %s844_s2, 4  ;;  %s585_s11 = int_to_ptr.vmem [resolvable:$true] %s584_s11 }
  0x2d   :  { %636 = vmatprep.subr.bf16.mxu0 %v690_v2  ;;  %666 = vmatprep.subr.bf16.mxu1 %v690_v2  ;;  %s812_s12 = scalar_lea.vmem %s585_s11, 2048  ;;  %p817_p3 = scmp.lt.s32.totalorder %s585_s11, %s585_s11 }
  0x2e   :  { %p813_p2 = scmp.ne.s32.totalorder %s585_s11, %s812_s12  ;;  %p818_p4 = scmp.lt.s32.totalorder %s812_s12, %s812_s12 }
  0x30   :  { %637 = vmatpush3.bf16.msra.mxu0 %v690_v2  ;;  %674 = vmatpush3.bf16.msra.mxu1 %v690_v2  ;;  %p819_p5 = por %p818_p4, %p817_p3 }
  0x31   :  { %638 = vmatprep.subr.bf16.mxu0 %v691_v3  ;;  %667 = vmatprep.subr.bf16.mxu1 %v691_v3 }
  0x32   :  { %p820_p6 = pnand %p819_p5, %p813_p2 }
  0x34   :  { %639 = vmatpush3.bf16.msra.mxu0 %v691_v3  ;;  %675 = vmatpush3.bf16.msra.mxu1 %v691_v3 }
  0x35   :  { %640 = vmatprep.subr.bf16.mxu0 %v692_v6  ;;  %668 = vmatprep.subr.bf16.mxu1 %v692_v6 }
  0x38   :  { %641 = vmatpush3.bf16.msra.mxu0 %v692_v6  ;;  %676 = vmatpush3.bf16.msra.mxu1 %v692_v6 }
  0x39   :  { %642 = vmatprep.subr.bf16.mxu0 %v693_v7  ;;  %669 = vmatprep.subr.bf16.mxu1 %v693_v7 }
  0x3c   :  { %643 = vmatpush3.bf16.msra.mxu0 %v693_v7  ;;  %677 = vmatpush3.bf16.msra.mxu1 %v693_v7 }
  0x3d   :  { %644 = vmatprep.subr.bf16.mxu0 %v694_v8  ;;  %670 = vmatprep.subr.bf16.mxu1 %v694_v8 }
  0x40   :  { %645 = vmatpush3.bf16.msra.mxu0 %v694_v8  ;;  %678 = vmatpush3.bf16.msra.mxu1 %v694_v8 }
  0x41   :  { %646 = vmatprep.subr.bf16.mxu0 %v695_v9  ;;  %671 = vmatprep.subr.bf16.mxu1 %v695_v9 }
  0x44   :  { %647 = vmatpush3.bf16.msra.mxu0 %v695_v9  ;;  %679 = vmatpush3.bf16.msra.mxu1 %v695_v9 }
  0x47   :  { %649 = vmatmul.mubr.bf16.vlgmr.msra.gmra.mrb[0].mxu0 %v698_v10  ;;  %657 = vmatmul.mubr.bf16.vlgmr.msra.gmra.mrb[0].mxu1 %v699_v11 }
  0x48   :  { %652 = vmatprep.mubr.bf16.mxu0 %v700_v12  ;;  %660 = vmatprep.mubr.bf16.mxu1 %v702_v13 }
  0x4f   :  { %653 = vmatmul.mubr.bf16.gmra.mrb[4].mxu0 %v701_v14  ;;  %661 = vmatmul.mubr.bf16.gmra.mrb[4].mxu1 %v703_v15 }
 0x11a   :  { %v650_v18 = vpop.f32.mrb[0].mxu0  ;;  %v658_v19 = vpop.f32.mrb[0].mxu1 }
 0x11b   :  { %v247_v21 = vpop.f32.mrb[1].mxu0  ;;  %v279_v22 = vpop.f32.mrb[1].mxu1  ;;  %v378_v27 = vadd.f32 %v658_v19, %v615_v20  ;;  %v370_v28 = vadd.f32 %v650_v18, %v615_v20 }
 0x11c   :  { %v651_v23 = vpop.f32.mrb[2].mxu0  ;;  %v659_v24 = vpop.f32.mrb[2].mxu1  ;;  %v368_v32 = vadd.f32 %v615_v20, %v247_v21  ;;  %v376_v40 = vadd.f32 %v615_v20, %v279_v22 }
 0x11d   :  { %v250_v25 = vpop.f32.mrb[3].mxu0  ;;  %v282_v26 = vpop.f32.mrb[3].mxu1  ;;  %v397_v29 = vsel %vm386_vm0, %v378_v27, -inf  ;;  %v389_v30 = vsel %vm386_vm0, %v370_v28, -inf  ;;  %v371_v31 = vadd.f32 %v651_v23, %v615_v20  ;;  %v379_v39 = vadd.f32 %v659_v24, %v615_v20 }
 0x11e   :  { %423 = vmax.xlane.f32.xlu0 %v397_v29  ;;  %407 = vmax.xlane.f32.xlu1 %v389_v30  ;;  %v387_v37 = vsel %vm386_vm0, %v368_v32, -inf  ;;  %v395_v46 = vsel %vm386_vm0, %v376_v40, -inf  ;;  %v377_v47 = vadd.f32 %v615_v20, %v282_v26  ;;  %v369_v48 = vadd.f32 %v615_v20, %v250_v25 }
 0x11f   :  { %v390_v36 = vsel %vm386_vm0, %v371_v31, -inf  ;;  %v398_v45 = vsel %vm386_vm0, %v379_v39, -inf }
 0x120   :  { %v396_v51 = vsel %vm386_vm0, %v377_v47, -inf  ;;  %v388_v52 = vsel %vm386_vm0, %v369_v48, -inf }
 0x122   :  { %v654_v33 = vpop.f32.mrb[4].mxu0  ;;  %v662_v34 = vpop.f32.mrb[4].mxu1  ;;  %409 = vmax.xlane.f32.xlu1 %v390_v36  ;;  %403 = vmax.xlane.f32.xlu0 %v387_v37 }
 0x123   :  { %v263_v35 = vpop.f32.mrb[5].mxu0  ;;  %v295_v38 = vpop.f32.mrb[5].mxu1  ;;  %v374_v50 = vadd.f32 %v654_v33, %v615_v20  ;;  %v382_v0 = vadd.f32 %v662_v34, %v615_v20 }
 0x124   :  { %v655_v41 = vpop.f32.mrb[6].mxu0  ;;  %v663_v42 = vpop.f32.mrb[6].mxu1  ;;  %v372_v56 = vadd.f32 %v615_v20, %v263_v35  ;;  %v380_v58 = vadd.f32 %v615_v20, %v295_v38 }
 0x125   :  { %v266_v43 = vpop.f32.mrb[7].mxu0  ;;  %v298_v44 = vpop.f32.mrb[7].mxu1  ;;  %v375_v49 = vadd.f32 %v655_v41, %v615_v20  ;;  %v393_v54 = vsel %vm386_vm0, %v374_v50, -inf  ;;  %v383_v63 = vadd.f32 %v663_v42, %v615_v20  ;;  %v937_v2 = vsel %vm386_vm0, %v382_v0, -inf }
 0x126   :  { %425 = vmax.xlane.f32.xlu1 %v398_v45  ;;  %419 = vmax.xlane.f32.xlu0 %v395_v46  ;;  %v373_v55 = vadd.f32 %v615_v20, %v266_v43  ;;  %v381_v57 = vadd.f32 %v615_v20, %v298_v44  ;;  %v391_v60 = vsel %vm386_vm0, %v372_v56, -inf  ;;  %v927_v62 = vsel %vm386_vm0, %v380_v58, -inf }
 0x127   :  { %v394_v53 = vsel %vm386_vm0, %v375_v49, -inf  ;;  %v933_v1 = vsel %vm386_vm0, %v383_v63, -inf }
 0x128   :  { %v392_v59 = vsel %vm386_vm0, %v373_v55, -inf  ;;  %v923_v61 = vsel %vm386_vm0, %v381_v57, -inf }
 0x12a   :  { %421 = vmax.xlane.f32.xlu1 %v396_v51  ;;  %405 = vmax.xlane.f32.xlu0 %v388_v52 }
 0x12e   :  { %417 = vmax.xlane.f32.xlu1 %v394_v53  ;;  %415 = vmax.xlane.f32.xlu0 %v393_v54 }
 0x132   :  { %413 = vmax.xlane.f32.xlu1 %v392_v59  ;;  %411 = vmax.xlane.f32.xlu0 %v391_v60 }
 0x136   :  { %429 = vmax.xlane.f32.xlu1 %v923_v61  ;;  %427 = vmax.xlane.f32.xlu0 %v927_v62 }
 0x13a   :  { %433 = vmax.xlane.f32.xlu1 %v933_v1  ;;  %431 = vmax.xlane.f32.xlu0 %v937_v2 }
 0x1ab   :  { %v424_v3 = vpop.xlane.xlu0 %423  ;;  %v408_v4 = vpop.xlane.xlu1 %407 }
 0x1ac   :  { %v941_v5 = vsub.f32 %v389_v30, %v408_v4  ;;  %v943_v6 = vsub.f32 %v397_v29, %v424_v3 }
 0x1ae   :  { %v455_v7 = vmul.f32 1.442695, %v941_v5  ;;  %v471_v11 = vmul.f32 1.442695, %v943_v6 }
 0x1af   :  { %v410_v8 = vpop.xlane.xlu1 %409  ;;  %v404_v9 = vpop.xlane.xlu0 %403 }
 0x1b0   :  { %v946_v10 = vsub.f32 %v390_v36, %v410_v8  ;;  %704 = vpow2.f32 %v455_v7  ;;  %v949_v12 = vsub.f32 %v387_v37, %v404_v9 }
 0x1b2   :  { %v457_v13 = vmul.f32 1.442695, %v946_v10  ;;  %v451_v18 = vmul.f32 1.442695, %v949_v12 }
 0x1b3   :  { %v426_v14 = vpop.xlane.xlu1 %425  ;;  %v420_v15 = vpop.xlane.xlu0 %419 }
 0x1b4   :  { %706 = vpow2.f32 %v457_v13  ;;  %v952_v16 = vsub.f32 %v398_v45, %v426_v14  ;;  %v954_v17 = vsub.f32 %v395_v46, %v420_v15 }
 0x1b5   :  { %708 = vpow2.f32 %v471_v11 }
 0x1b6   :  { %v473_v19 = vmul.f32 1.442695, %v952_v16  ;;  %v467_v22 = vmul.f32 1.442695, %v954_v17 }
 0x1b7   :  { %v422_v20 = vpop.xlane.xlu1 %421  ;;  %v406_v21 = vpop.xlane.xlu0 %405 }
 0x1b8   :  { %710 = vpow2.f32 %v473_v19  ;;  %v959_v23 = vsub.f32 %v396_v51, %v422_v20  ;;  %v961_v24 = vsub.f32 %v388_v52, %v406_v21 }
 0x1b9   :  { %712 = vpow2.f32 %v451_v18 }
 0x1ba   :  { %v453_v25 = vmul.f32 1.442695, %v961_v24  ;;  %v705_v26 = vpop.eup %704  ;;  %714 = vpow2.f32 %v467_v22  ;;  %v469_v29 = vmul.f32 1.442695, %v959_v23 }
 0x1bb   :  { %v418_v27 = vpop.xlane.xlu1 %417  ;;  %v416_v28 = vpop.xlane.xlu0 %415  ;;  %487 = vadd.xlane.f32.xlu0 %v705_v26 }
 0x1bc   :  { %v965_v30 = vsub.f32 %v394_v53, %v418_v27  ;;  %v967_v31 = vsub.f32 %v393_v54, %v416_v28  ;;  %716 = vpow2.f32 %v453_v25 }
 0x1bd   :  { %718 = vpow2.f32 %v469_v29 }
 0x1be   :  { %v707_v32 = vpop.eup %706  ;;  %v463_v33 = vmul.f32 1.442695, %v967_v31  ;;  %v465_v37 = vmul.f32 1.442695, %v965_v30 }
 0x1bf   :  { %v709_v34 = vpop.eup %708  ;;  %489 = vadd.xlane.f32.xlu1 %v707_v32  ;;  %v414_v35 = vpop.xlane.xlu1 %413 }
 0x1c0   :  { %v412_v36 = vpop.xlane.xlu0 %411  ;;  %v971_v38 = vsub.f32 %v392_v59, %v414_v35  ;;  %503 = vadd.xlane.f32.xlu0 %v709_v34  ;;  %720 = vpow2.f32 %v463_v33 }
 0x1c1   :  { %v973_v39 = vsub.f32 %v391_v60, %v412_v36  ;;  %722 = vpow2.f32 %v465_v37 }
 0x1c2   :  { %v711_v40 = vpop.eup %710  ;;  %v461_v45 = vmul.f32 1.442695, %v971_v38 }
 0x1c3   :  { %v459_v41 = vmul.f32 1.442695, %v973_v39  ;;  %v713_v42 = vpop.eup %712  ;;  %505 = vadd.xlane.f32.xlu1 %v711_v40  ;;  %v430_v43 = vpop.xlane.xlu1 %429 }
 0x1c4   :  { %v428_v44 = vpop.xlane.xlu0 %427  ;;  %v978_v46 = vsub.f32 %v923_v61, %v430_v43  ;;  %483 = vadd.xlane.f32.xlu0 %v713_v42  ;;  %v715_v48 = vpop.eup %714 }
 0x1c5   :  { %v981_v47 = vsub.f32 %v927_v62, %v428_v44  ;;  %724 = vpow2.f32 %v459_v41 }
 0x1c6   :  { %v717_v50 = vpop.eup %716  ;;  %726 = vpow2.f32 %v461_v45  ;;  %v477_v53 = vmul.f32 1.442695, %v978_v46 }
 0x1c7   :  { %v475_v49 = vmul.f32 1.442695, %v981_v47  ;;  %v434_v51 = vpop.xlane.xlu1 %433  ;;  %485 = vadd.xlane.f32.xlu1 %v717_v50  ;;  %v719_v56 = vpop.eup %718 }
 0x1c8   :  { %v432_v52 = vpop.xlane.xlu0 %431  ;;  %499 = vadd.xlane.f32.xlu0 %v715_v48  ;;  %v989_v55 = vsub.f32 %v933_v1, %v434_v51 }
 0x1c9   :  { %v986_v54 = vsub.f32 %v937_v2, %v432_v52  ;;  %728 = vpow2.f32 %v475_v49 }
 0x1ca   :  { %v721_v58 = vpop.eup %720  ;;  %730 = vpow2.f32 %v477_v53  ;;  %v481_v59 = vmul.f32 1.442695, %v989_v55 }
 0x1cb   :  { %v479_v57 = vmul.f32 1.442695, %v986_v54  ;;  %501 = vadd.xlane.f32.xlu1 %v719_v56  ;;  %v723_v60 = vpop.eup %722 }
 0x1cc   :  { %495 = vadd.xlane.f32.xlu0 %v721_v58 }
 0x1cd   :  { %732 = vpow2.f32 %v479_v57 }
 0x1ce   :  { %734 = vpow2.f32 %v481_v59 }
 0x1cf   :  { %v725_v61 = vpop.eup %724  ;;  %497 = vadd.xlane.f32.xlu1 %v723_v60 }
 0x1d0   :  { %491 = vadd.xlane.f32.xlu0 %v725_v61  ;;  %v727_v62 = vpop.eup %726 }
 0x1d3   :  { %v729_v63 = vpop.eup %728  ;;  %493 = vadd.xlane.f32.xlu1 %v727_v62 }
 0x1d4   :  { %507 = vadd.xlane.f32.xlu0 %v729_v63  ;;  %v731_v0 = vpop.eup %730 }
 0x1d7   :  { %v733_v1 = vpop.eup %732  ;;  %509 = vadd.xlane.f32.xlu1 %v731_v0 }
 0x1d8   :  { %511 = vadd.xlane.f32.xlu0 %v733_v1  ;;  %v735_v2 = vpop.eup %734 }
 0x1db   :  { %513 = vadd.xlane.f32.xlu1 %v735_v2 }
 0x248   :  { %v488_v3 = vpop.xlane.xlu0 %487 }
 0x249   :  { %736 = vlog2.f32 %v488_v3 }
 0x24c   :  { %v490_v4 = vpop.xlane.xlu1 %489 }
 0x24d   :  { %738 = vlog2.f32 %v490_v4  ;;  %v504_v7 = vpop.xlane.xlu0 %503 }
 0x24e   :  { %740 = vlog2.f32 %v504_v7 }
 0x250   :  { %v506_v8 = vpop.xlane.xlu1 %505 }
 0x251   :  { %742 = vlog2.f32 %v506_v8  ;;  %v484_v9 = vpop.xlane.xlu0 %483 }
 0x252   :  { %744 = vlog2.f32 %v484_v9 }
 0x253   :  { %v737_v11 = vpop.eup %736 }
 0x254   :  { %v520_v13 = vmul.f32 0.6931472, %v737_v11  ;;  %v486_v14 = vpop.xlane.xlu1 %485 }
 0x255   :  { %v500_v15 = vpop.xlane.xlu0 %499  ;;  %746 = vlog2.f32 %v486_v14 }
 0x256   :  { %v549_v19 = vsub.f32 %v941_v5, %v520_v13  ;;  %748 = vlog2.f32 %v500_v15 }
 0x257   :  { %v739_v18 = vpop.eup %738 }
 0x258   :  { %v741_v20 = vpop.eup %740  ;;  %v522_v21 = vmul.f32 0.6931472, %v739_v18  ;;  %565 = vst [vmem:[#allocation7 + $0x10] sm:$0xff] %v549_v19  ;;  %v502_v25 = vpop.xlane.xlu1 %501 }
 0x259   :  { %v536_v22 = vmul.f32 0.6931472, %v741_v20  ;;  %v496_v26 = vpop.xlane.xlu0 %495  ;;  %750 = vlog2.f32 %v502_v25 }
 0x25a   :  { %v550_v27 = vsub.f32 %v946_v10, %v522_v21  ;;  %752 = vlog2.f32 %v496_v26 }
 0x25b   :  { %v743_v28 = vpop.eup %742  ;;  %v557_v29 = vsub.f32 %v943_v6, %v536_v22 }
 0x25c   :  { %v745_v32 = vpop.eup %744  ;;  %566 = vst [vmem:[#allocation7 + $0x18] sm:$0xff] %v550_v27  ;;  %v538_v33 = vmul.f32 0.6931472, %v743_v28  ;;  %v498_v5 = vpop.xlane.xlu1 %497 }
 0x25d   :  { %573 = vst [vmem:[#allocation7 + $0x50] sm:$0xff] %v557_v29  ;;  %v516_v34 = vmul.f32 0.6931472, %v745_v32  ;;  %v492_v35 = vpop.xlane.xlu0 %491  ;;  %754 = vlog2.f32 %v498_v5 }
 0x25e   :  { %v558_v36 = vsub.f32 %v952_v16, %v538_v33  ;;  %756 = vlog2.f32 %v492_v35 }
 0x25f   :  { %v547_v37 = vsub.f32 %v949_v12, %v516_v34  ;;  %v747_v40 = vpop.eup %746 }
 0x260   :  { %574 = vst [vmem:[#allocation7 + $0x58] sm:$0xff] %v558_v36  ;;  %v749_v10 = vpop.eup %748  ;;  %v518_v41 = vmul.f32 0.6931472, %v747_v40  ;;  %v494_v6 = vpop.xlane.xlu1 %493 }
 0x261   :  { %563 = vst [vmem:[#allocation7] sm:$0xff] %v547_v37  ;;  %v508_v42 = vpop.xlane.xlu0 %507  ;;  %v532_v43 = vmul.f32 0.6931472, %v749_v10  ;;  %758 = vlog2.f32 %v494_v6 }
 0x262   :  { %v548_v44 = vsub.f32 %v961_v24, %v518_v41  ;;  %760 = vlog2.f32 %v508_v42 }
 0x263   :  { %v751_v45 = vpop.eup %750  ;;  %v555_v48 = vsub.f32 %v954_v17, %v532_v43 }
 0x264   :  { %v753_v16 = vpop.eup %752  ;;  %564 = vst [vmem:[#allocation7 + $0x8] sm:$0xff] %v548_v44  ;;  %v534_v49 = vmul.f32 0.6931472, %v751_v45  ;;  %v510_v12 = vpop.xlane.xlu1 %509 }
 0x265   :  { %v512_v50 = vpop.xlane.xlu0 %511  ;;  %571 = vst [vmem:[#allocation7 + $0x40] sm:$0xff] %v555_v48  ;;  %v528_v51 = vmul.f32 0.6931472, %v753_v16  ;;  %762 = vlog2.f32 %v510_v12 }
 0x266   :  { %v556_v52 = vsub.f32 %v959_v23, %v534_v49  ;;  %764 = vlog2.f32 %v512_v50 }
 0x267   :  { %v755_v53 = vpop.eup %754  ;;  %v553_v56 = vsub.f32 %v967_v31, %v528_v51 }
 0x268   :  { %v757_v57 = vpop.eup %756  ;;  %572 = vst [vmem:[#allocation7 + $0x48] sm:$0xff] %v556_v52  ;;  %v530_v24 = vmul.f32 0.6931472, %v755_v53  ;;  %v514_v58 = vpop.xlane.xlu1 %513 }
 0x269   :  { %569 = vst [vmem:[#allocation7 + $0x30] sm:$0xff] %v553_v56  ;;  %v524_v17 = vmul.f32 0.6931472, %v757_v57  ;;  %766 = vlog2.f32 %v514_v58 }
 0x26a   :  { %v554_v59 = vsub.f32 %v965_v30, %v530_v24 }
 0x26b   :  { %v759_v60 = vpop.eup %758  ;;  %v551_v61 = vsub.f32 %v973_v39, %v524_v17 }
 0x26c   :  { %v761_v62 = vpop.eup %760  ;;  %570 = vst [vmem:[#allocation7 + $0x38] sm:$0xff] %v554_v59  ;;  %v526_v63 = vmul.f32 0.6931472, %v759_v60 }
 0x26d   :  { %567 = vst [vmem:[#allocation7 + $0x20] sm:$0xff] %v551_v61  ;;  %v540_v23 = vmul.f32 0.6931472, %v761_v62 }
 0x26e   :  { %v552_v0 = vsub.f32 %v971_v38, %v526_v63 }
 0x26f   :  { %v763_v31 = vpop.eup %762  ;;  %v559_v1 = vsub.f32 %v981_v47, %v540_v23 }
 0x270   :  { %v765_v2 = vpop.eup %764  ;;  %568 = vst [vmem:[#allocation7 + $0x28] sm:$0xff] %v552_v0  ;;  %v542_v3 = vmul.f32 0.6931472, %v763_v31 }
 0x271   :  { %575 = vst [vmem:[#allocation7 + $0x60] sm:$0xff] %v559_v1  ;;  %v544_v4 = vmul.f32 0.6931472, %v765_v2 }
 0x272   :  { %v560_v30 = vsub.f32 %v978_v46, %v542_v3 }
 0x273   :  { %v767_v7 = vpop.eup %766  ;;  %v561_v39 = vsub.f32 %v986_v54, %v544_v4 }
 0x274   :  { %576 = vst [vmem:[#allocation7 + $0x68] sm:$0xff] %v560_v30  ;;  %v546_v8 = vmul.f32 0.6931472, %v767_v7 }
 0x275   :  { %577 = vst [vmem:[#allocation7 + $0x70] sm:$0xff] %v561_v39 }
 0x276   :  { %v562_v38 = vsub.f32 %v989_v55, %v546_v8 }
 0x278   :  { %578 = vst [vmem:[#allocation7 + $0x78] sm:$0xff] %v562_v38 }
 0x279   :  { %823 = shalt.err (!%p820_p6)
}
 0x27a   :  { %s824_s15 = scalar_lea.hbm %s1024_s3, 2048 }
 0x27b   :  { %p825_p7 = scmp.ne.s32.totalorder %s1024_s3, %s824_s15  ;;  %p828_p8 = scmp.lt.u32.totalorder %s824_s15, %s1024_s3 }
 0x27d   :  { %p830_p9 = pnand %p828_p8, %p825_p7 }
 0x27f   :  { %833 = shalt.err (!%p830_p9)
}
 0x280   :  { %s845_s20 = smov 128   ;;  %s846_s21 = smov 8  }
 0x281   :  { %590 = dma.vmem_to_hbm [thread:$0]  %s585_s11, 2048, %s1024_s3, [#allocation4], %s845_s20, %s845_s20, %s846_s21  }
 0x282   :  { %838 = dma.done.wait [#allocation4], 2048  }
 0x283   :  { %839 = vsyncadd [#allocation4], 4294965248 }
 0x284   :  { %594 = vsyncpa [#allocation3], 1 }
 0x285   :  { %595 = vsyncpa [#allocation6], 1 }
 0x286   :  { %596 = vsyncpa [#allocation4], 1 }

</bundles_post_ra>
